<compile_context>
chip_gen: v5e
topology: v5e:2x2
jax: 0.10.0
libtpu: 0.0.40
codegen_flags: <defaults>
</compile_context>

<pallas_src>
import functools

import jax
import jax.numpy as jnp
from jax.experimental import pallas as pl
from jax.experimental.pallas import tpu as pltpu


def _round_up(x: int, m: int) -> int:
    return ((x + m - 1) // m) * m


def linear_kernel(x_ref, w_ref, b_ref, o_ref):
    # x_ref: [TB, F] f32 (streamed), w_ref: [F, C_pad] bf16 (resident, pre-transposed),
    # b_ref: [1, C_pad] f32 (resident), o_ref: [TB, C_pad] f32
    x_bf = x_ref[...].astype(jnp.bfloat16)        # in-kernel cast, overlapped with DMA
    acc = jax.lax.dot_general(
        x_bf, w_ref[...],
        dimension_numbers=(((1,), (0,)), ((), ())),  # (TB,F) x (F,C_pad)
        preferred_element_type=jnp.float32,          # f32 accumulation on MXU
    )
    o_ref[...] = acc + b_ref[...]                    # bias add in f32, lane-dense store


@functools.partial(jax.jit, static_argnames=("block_b",))
def logistic_regression_forward(x, weight, bias, *, block_b=1024):
    """x: [B, F] float32; weight: [C, F] (PyTorch nn.Linear layout); bias: [C]."""
    B, F = x.shape
    C = weight.shape[0]

    # --- lane-dense class padding + one-time weight transpose (tiny) ---
    C_pad = _round_up(max(C, 128), 128)
    w_t = jnp.zeros((F, C_pad), dtype=jnp.bfloat16).at[:, :C].set(
        weight.astype(jnp.bfloat16).T)
    b_pad = jnp.zeros((1, C_pad), dtype=jnp.float32).at[0, :C].set(
        bias.astype(jnp.float32))

    # --- batch tiling: sublane-aligned, >=2 grid steps when batch allows (v7x), ---
    # --- pad x only if the chosen tile doesn't already divide the batch.        ---
    B_aligned = _round_up(B, 8)
    TB = min(block_b, B_aligned)
    if B_aligned // TB < 2 and B_aligned >= 16:
        TB = _round_up(B_aligned // 2, 8)          # feed both TensorCores on v7x
    B_pad = _round_up(B_aligned, TB)
    if B_pad != B:
        x = jnp.pad(x, ((0, B_pad - B), (0, 0)))   # only fires when needed

    grid = (B_pad // TB,)
    out = pl.pallas_call(
        linear_kernel,
        out_shape=jax.ShapeDtypeStruct((B_pad, C_pad), jnp.float32),
        grid=grid,
        in_specs=[
            pl.BlockSpec((TB, F), lambda i: (i, 0)),        # x streams f32 per step
            pl.BlockSpec((F, C_pad), lambda i: (0, 0)),     # weight resident (bf16)
            pl.BlockSpec((1, C_pad), lambda i: (0, 0)),     # bias resident (f32)
        ],
        out_specs=pl.BlockSpec((TB, C_pad), lambda i: (i, 0)),
        compiler_params=pltpu.CompilerParams(
            dimension_semantics=("parallel",),              # shard batch across TCs (v7x)
            vmem_limit_bytes=64 << 20,                      # headroom for large TB on v5e
        ),
    )(x, w_t, b_pad)

    # Drop batch padding and the zero-padded class columns.
    return out[:B, :C]


if __name__ == "__main__":
    # Module hyperparameters (defaults of LogisticRegression).
    input_size, num_classes, channels = 28, 10, 1
    F = input_size * input_size * channels   # 784
    B = 256                                  # wrapper picks TB=128 -> grid = (2,)

    key = jax.random.PRNGKey(0)
    kx, kw, kb = jax.random.split(key, 3)

    # Deterministic parameter init mimicking torch.nn.Linear's uniform init.
    bound = 1.0 / jnp.sqrt(float(F))
    weight = jax.random.uniform(kw, (num_classes, F), jnp.float32, -bound, bound)
    bias = jax.random.uniform(kb, (num_classes,), jnp.float32, -bound, bound)

    x = jax.random.normal(kx, (B, F), jnp.float32)

    out = logistic_regression_forward(x, weight, bias)
    out = jax.block_until_ready(out)
    assert out.shape == (B, num_classes)

    # Reference with the same bf16 rounding of the matmul operands (tight tolerance).
    x_bf = x.astype(jnp.bfloat16).astype(jnp.float32)
    w_bf = weight.astype(jnp.bfloat16).astype(jnp.float32)
    ref_bf = x_bf @ w_bf.T + bias
    assert jnp.allclose(out, ref_bf, atol=1e-3, rtol=1e-3)

    # Sanity check against the full-f32 reference (loosened for bf16 matmul operands).
    ref_f32 = x @ weight.T + bias
    assert jnp.allclose(out, ref_f32, atol=5e-2, rtol=5e-2)

    print("KERNEL_OK")
</pallas_src>

<mosaic_0001>
module attributes {stable_mosaic.version = 11 : i64} {
  func.func @linear_kernel(%arg0: i32, %arg1: memref<128x784xf32, #tpu.memory_space<vmem>>, %arg2: memref<784x128xbf16, #tpu.memory_space<vmem>>, %arg3: memref<1x128xf32, #tpu.memory_space<vmem>>, %arg4: memref<128x128xf32, #tpu.memory_space<vmem>>) attributes {dimension_semantics = [#tpu.dimension_semantics<parallel>], iteration_bounds = array<i64: 2>, scalar_prefetch = 0 : i64, scratch_operands = 0 : i64, tpu.core_type = #tpu.core_type<tc>, window_params = [{transform_indices = @transform_0, window_bounds = array<i64: 128, 784>}, {pipeline_mode = #tpu.pipeline_mode<synchronous>, transform_indices = @transform_1, window_bounds = array<i64: 784, 128>}, {pipeline_mode = #tpu.pipeline_mode<synchronous>, transform_indices = @transform_2, window_bounds = array<i64: 1, 128>}, {transform_indices = @transform_3, window_bounds = array<i64: 128, 128>}]} {
    %c0 = arith.constant 0 : index
    %c0_0 = arith.constant 0 : index
    %0 = vector.load %arg1[%c0, %c0_0] : memref<128x784xf32, #tpu.memory_space<vmem>>, vector<128x784xf32>
    %1 = arith.truncf %0 : vector<128x784xf32> to vector<128x784xbf16>
    %c0_1 = arith.constant 0 : index
    %c0_2 = arith.constant 0 : index
    %2 = vector.load %arg2[%c0_1, %c0_2] : memref<784x128xbf16, #tpu.memory_space<vmem>>, vector<784x128xbf16>
    %cst = arith.constant dense<0.000000e+00> : vector<128x128xf32>
    %3 = tpu.matmul %1, %2, %cst {dimension_numbers = #tpu.dot_dimension_numbers<[1], [0], [0], [1], [0, 0, 1, 1], [], []>} : vector<128x784xbf16>, vector<784x128xbf16>, vector<128x128xf32> -> vector<128x128xf32>
    %c0_3 = arith.constant 0 : index
    %c0_4 = arith.constant 0 : index
    %4 = vector.load %arg3[%c0_3, %c0_4] : memref<1x128xf32, #tpu.memory_space<vmem>>, vector<1x128xf32>
    %5 = vector.broadcast %4 : vector<1x128xf32> to vector<128x128xf32>
    %6 = arith.addf %3, %5 : vector<128x128xf32>
    %c0_5 = arith.constant 0 : index
    %c0_6 = arith.constant 0 : index
    %7 = vector.load %arg4[%c0_5, %c0_6] : memref<128x128xf32, #tpu.memory_space<vmem>>, vector<128x128xf32>
    tpu.vector_store %arg4[%c0_5, %c0_6], %6 {strides = array<i32>} : memref<128x128xf32, #tpu.memory_space<vmem>>, vector<128x128xf32>,
    return
  }
  func.func @transform_0(%arg0: i32) -> (i32, i32) {
    %c0_i32 = arith.constant 0 : i32
    %c0_i32_0 = arith.constant 0 : i32
    return %arg0, %c0_i32 : i32, i32
  }
  func.func @transform_1(%arg0: i32) -> (i32, i32) {
    %c0_i32 = arith.constant 0 : i32
    %c0_i32_0 = arith.constant 0 : i32
    %c0_i32_1 = arith.constant 0 : i32
    return %c0_i32, %c0_i32_0 : i32, i32
  }
  func.func @transform_2(%arg0: i32) -> (i32, i32) {
    %c0_i32 = arith.constant 0 : i32
    %c0_i32_0 = arith.constant 0 : i32
    %c0_i32_1 = arith.constant 0 : i32
    return %c0_i32, %c0_i32_0 : i32, i32
  }
  func.func @transform_3(%arg0: i32) -> (i32, i32) {
    %c0_i32 = arith.constant 0 : i32
    %c0_i32_0 = arith.constant 0 : i32
    return %arg0, %c0_i32 : i32, i32
  }
}

</mosaic_0001>

<bundles_post_ra>
// kernel: logistic_regression_forward.1
= control target key start
LH: loop header
LB: loop body
LE: loop exit
PB: predicated region body
PF: predicated region fallthrough
CT: control target
= control target key end

     0   :  { %s1508_s12 = smov 0   ;;  %s1961_s0 = inlined_call_operand.vmem [shape: f32[256,784], index: 0, kind: input, shape index: {}]   ;;  %s1962_s1 = inlined_call_operand.vmem [shape: bf16[784,128], index: 1, kind: input, shape index: {}]   ;;  %s1963_s2 = inlined_call_operand.vmem [shape: f32[1,128], index: 2, kind: input, shape index: {}]   ;;  %s1964_s3 = inlined_call_operand.vmem [shape: f32[256,128], index: 3, kind: output, shape index: {}]  }
   0x1 LB: > { %s1182_s13 = sadd.s32 4294967295, %s1486_s12   ;;  %p1186_p0 = scmp.ge.s32.totalorder %s1486_s12, 1  ;;  %s1486_s12 = sphi %s1508_s12, %s13_s12  }
   0x2   : > { %p139_p1 = scmp.lt.s32.totalorder %s1486_s12, 3 }
   0x4   : > { %p140_p2 = pnand %p1186_p0, %p139_p1 }
   0x5   : > { %s1187_s5 = sshll.u32 (!%p140_p2), %s1182_s13, 4 }
   0x6   : > { %143 = sbr.rel (%p140_p2) target bundleno = 400 (0x190), region = 32  ;;  %p165_p3 = scmp.lt.s32.totalorder (!%p140_p2), %s1187_s5, 31 }
   0xb   : > { %v1404_v0 = vld [vmem:[%s1962_s1 + $0x38] sm:$0xff]  ;;  %v1403_v3 = vld [vmem:[%s1962_s1 + $0x30] sm:$0xff]  ;;  %v1402_v6 = vld [vmem:[%s1962_s1 + $0x28] sm:$0xff]  ;;  %s1966_s5 = smov (!%p165_p3, %s1187_s5), 31  ;;  %vm742_vm0 = vcmask 130048  }
   0xc   : > { %v1522_v1 = vld [vmem:[%s1962_s1 + $0xb8] sm:$0xff]  ;;  %767 = vmatpush.bf16.msra.mxu0 %v1404_v0  ;;  %1446 = vmatpush.bf16.msra.mxu3 %v1404_v0  ;;  %v1537_v4 = vld [vmem:[%s1962_s1 + $0xb0] sm:$0xff]  ;;  %v1552_v7 = vld [vmem:[%s1962_s1 + $0xa8] sm:$0xff]  ;;  %s1470_s21 = smul.u32 56, %s1966_s5 }
   0xd   : > { %v1527_v2 = vld [vmem:[%s1962_s1 + $0x78] sm:$0xff]  ;;  %1462 = vmatpush.bf16.msra.mxu2 %v1522_v1  ;;  %v1542_v5 = vld [vmem:[%s1962_s1 + $0x70] sm:$0xff]  ;;  %v1557_v8 = vld [vmem:[%s1962_s1 + $0x68] sm:$0xff] }
   0xe   : > { %1454 = vmatpush.bf16.msra.mxu1 %v1527_v2  ;;  %v1401_v9 = vld [vmem:[%s1962_s1 + $0x20] sm:$0xff]  ;;  %v1400_v12 = vld [vmem:[%s1962_s1 + $0x18] sm:$0xff]  ;;  %v1399_v15 = vld [vmem:[%s1962_s1 + $0x10] sm:$0xff]  ;;  %s1613_s30 = scalar_lea.vmem %s1961_s0, %s1470_s21 }
   0xf   : > { %v1567_v10 = vld [vmem:[%s1962_s1 + $0xa0] sm:$0xff]  ;;  %v1584_v13 = vld [vmem:[%s1962_s1 + $0x98] sm:$0xff]  ;;  %v1600_v16 = vld [vmem:[%s1962_s1 + $0x90] sm:$0xff] }
  0x10   : > { %768 = vmatpush.bf16.msra.mxu0 %v1403_v3  ;;  %1447 = vmatpush.bf16.msra.mxu3 %v1403_v3  ;;  %v1572_v11 = vld [vmem:[%s1962_s1 + $0x60] sm:$0xff]  ;;  %v1589_v14 = vld [vmem:[%s1962_s1 + $0x58] sm:$0xff]  ;;  %v1605_v17 = vld [vmem:[%s1962_s1 + $0x50] sm:$0xff] }
  0x11   : > { %1463 = vmatpush.bf16.msra.mxu2 %v1537_v4  ;;  %v1398_v18 = vld [vmem:[%s1962_s1 + $0x8] sm:$0xff]  ;;  %v1397_v21 = vld [vmem:[%s1962_s1] sm:$0xff]  ;;  %v185_v25 = vld [vmem:[%s1613_s30 + $0x38] sm:$0xff] }
  0x12   : > { %1455 = vmatpush.bf16.msra.mxu1 %v1542_v5  ;;  %v1620_v19 = vld [vmem:[%s1962_s1 + $0x88] sm:$0xff]  ;;  %v1633_v22 = vld [vmem:[%s1962_s1 + $0x80] sm:$0xff]  ;;  %v213_v27 = vld [vmem:[%s1613_s30 + $0x118] sm:$0xff] }
  0x13   : > { %v1625_v20 = vld [vmem:[%s1962_s1 + $0x48] sm:$0xff]  ;;  %v1638_v23 = vld [vmem:[%s1962_s1 + $0x40] sm:$0xff]  ;;  %v208_v28 = vld [vmem:[%s1613_s30 + $0xf0] sm:$0xff] }
  0x14   : > { %769 = vmatpush.bf16.msra.mxu0 %v1402_v6  ;;  %1448 = vmatpush.bf16.msra.mxu3 %v1402_v6  ;;  %v178_v24 = vld [vmem:[%s1613_s30] sm:$0xff]  ;;  %v215_v29 = vld [vmem:[%s1613_s30 + $0x128] sm:$0xff]  ;;  %v1428_v32 = vld [vmem:[%s1962_s1 + $0xf8] sm:$0xff] }
  0x15   : > { %1464 = vmatpush.bf16.msra.mxu2 %v1552_v7  ;;  %v206_v26 = vld [vmem:[%s1613_s30 + $0xe0] sm:$0xff]  ;;  %v207_v30 = vld [vmem:[%s1613_s30 + $0xe8] sm:$0xff]  ;;  %v290_v33 = vpack.c.bf16 %v185_v25, %v178_v24  ;;  %v306_v35 = vpack.c.bf16 %v215_v29, %v208_v28  ;;  %v1444_v38 = vld [vmem:[%s1962_s1 + $0x178] sm:$0xff] }
  0x16   : > { %1456 = vmatpush.bf16.msra.mxu1 %v1557_v8  ;;  %v214_v31 = vld [vmem:[%s1613_s30 + $0x120] sm:$0xff]  ;;  %v304_v34 = vpack.c.bf16 %v213_v27, %v206_v26  ;;  %v1427_v39 = vld [vmem:[%s1962_s1 + $0xf0] sm:$0xff]  ;;  %v1426_v41 = vld [vmem:[%s1962_s1 + $0xe8] sm:$0xff] }
  0x17   : > { %v305_v36 = vpack.c.bf16 %v214_v31, %v207_v30  ;;  %v1445_v37 = vld [vmem:[%s1962_s1 + $0x180] sm:$0xff]  ;;  %v1443_v40 = vld [vmem:[%s1962_s1 + $0x170] sm:$0xff]  ;;  %v1442_v42 = vld [vmem:[%s1962_s1 + $0x168] sm:$0xff] }
  0x18   : > { %770 = vmatpush.bf16.msra.mxu0 %v1401_v9  ;;  %1449 = vmatpush.bf16.msra.mxu3 %v1401_v9  ;;  %v1425_v43 = vld [vmem:[%s1962_s1 + $0xe0] sm:$0xff]  ;;  %v192_v44 = vld [vmem:[%s1613_s30 + $0x70] sm:$0xff]  ;;  %v199_v45 = vld [vmem:[%s1613_s30 + $0xa8] sm:$0xff] }
  0x19   : > { %1465 = vmatpush.bf16.msra.mxu2 %v1567_v10  ;;  %v220_v46 = vld [vmem:[%s1613_s30 + $0x150] sm:$0xff]  ;;  %v227_v47 = vld [vmem:[%s1613_s30 + $0x188] sm:$0xff]  ;;  %v222_v48 = vld [vmem:[%s1613_s30 + $0x160] sm:$0xff]  ;;  %v297_v53 = vpack.c.bf16 %v199_v45, %v192_v44 }
  0x1a   : > { %1457 = vmatpush.bf16.msra.mxu1 %v1572_v11  ;;  %v229_v49 = vld [vmem:[%s1613_s30 + $0x198] sm:$0xff]  ;;  %v228_v51 = vld [vmem:[%s1613_s30 + $0x190] sm:$0xff]  ;;  %v1441_v52 = vld [vmem:[%s1962_s1 + $0x160] sm:$0xff]  ;;  %v311_v54 = vpack.c.bf16 %v227_v47, %v220_v46 }
  0x1b   : > { %v221_v50 = vld [vmem:[%s1613_s30 + $0x158] sm:$0xff]  ;;  %v313_v55 = vpack.c.bf16 %v229_v49, %v222_v48  ;;  %v1423_v59 = vld [vmem:[%s1962_s1 + $0xd0] sm:$0xff]  ;;  %v234_v60 = vld [vmem:[%s1613_s30 + $0x1c0] sm:$0xff] }
  0x1c   : > { %771 = vmatpush.bf16.msra.mxu0 %v1400_v12  ;;  %1450 = vmatpush.bf16.msra.mxu3 %v1400_v12  ;;  %v312_v56 = vpack.c.bf16 %v228_v51, %v221_v50  ;;  %v1424_v57 = vld [vmem:[%s1962_s1 + $0xd8] sm:$0xff]  ;;  %v179_v62 = vld [vmem:[%s1613_s30 + $0x8] sm:$0xff]  ;;  %v186_v63 = vld [vmem:[%s1613_s30 + $0x40] sm:$0xff] }
  0x1d   : > { %1466 = vmatpush.bf16.msra.mxu2 %v1584_v13  ;;  %v1440_v58 = vld [vmem:[%s1962_s1 + $0x158] sm:$0xff]  ;;  %v236_v0 = vld [vmem:[%s1613_s30 + $0x1d0] sm:$0xff]  ;;  %v235_v3 = vld [vmem:[%s1613_s30 + $0x1c8] sm:$0xff] }
  0x1e   : > { %1458 = vmatpush.bf16.msra.mxu1 %v1589_v14  ;;  %v241_v61 = vld [vmem:[%s1613_s30 + $0x1f8] sm:$0xff]  ;;  %v1439_v12 = vld [vmem:[%s1962_s1 + $0x150] sm:$0xff]  ;;  %v1437_v28 = vld [vmem:[%s1962_s1 + $0x140] sm:$0xff] }
  0x1f   : > { %v318_v6 = vpack.c.bf16 %v241_v61, %v234_v60  ;;  %v256_v24 = vld [vmem:[%s1613_s30 + $0x270] sm:$0xff]  ;;  %v262_v29 = vld [vmem:[%s1613_s30 + $0x2a0] sm:$0xff]  ;;  %v269_v30 = vld [vmem:[%s1613_s30 + $0x2d8] sm:$0xff] }
  0x20   : > { %772 = vmatpush.bf16.msra.mxu0 %v1399_v15  ;;  %1451 = vmatpush.bf16.msra.mxu3 %v1399_v15  ;;  %v255_v15 = vld [vmem:[%s1613_s30 + $0x268] sm:$0xff]  ;;  %v180_v31 = vld [vmem:[%s1613_s30 + $0x10] sm:$0xff]  ;;  %v194_v44 = vld [vmem:[%s1613_s30 + $0x80] sm:$0xff] }
  0x21   : > { %1467 = vmatpush.bf16.msra.mxu2 %v1600_v16  ;;  %v201_v45 = vld [vmem:[%s1613_s30 + $0xb8] sm:$0xff]  ;;  %v278_v46 = vld [vmem:[%s1613_s30 + $0x320] sm:$0xff]  ;;  %v284_v49 = vld [vmem:[%s1613_s30 + $0x350] sm:$0xff] }
  0x22   : > { %1459 = vmatpush.bf16.msra.mxu1 %v1605_v17  ;;  %v285_v47 = vld [vmem:[%s1613_s30 + $0x358] sm:$0xff]  ;;  %v1431_v50 = vld [vmem:[%s1962_s1 + $0x110] sm:$0xff] }
  0x23   : > { %v277_v48 = vld [vmem:[%s1613_s30 + $0x318] sm:$0xff]  ;;  %v184_v61 = vld [vmem:[%s1613_s30 + $0x30] sm:$0xff] }
  0x24   : > { %773 = vmatpush.bf16.msra.mxu0 %v1398_v18  ;;  %1452 = vmatpush.bf16.msra.mxu3 %v1398_v18  ;;  %v200_v18 = vld [vmem:[%s1613_s30 + $0xb0] sm:$0xff]  ;;  %v189_v60 = vld [vmem:[%s1613_s30 + $0x58] sm:$0xff] }
  0x25   : > { %1468 = vmatpush.bf16.msra.mxu2 %v1620_v19 }
  0x26   : > { %1460 = vmatpush.bf16.msra.mxu1 %v1625_v20 }
  0x28   : > { %774 = vmatpush.bf16.msra.mxu0 %v1397_v21  ;;  %1453 = vmatpush.bf16.msra.mxu3 %v1397_v21  ;;  %v257_v21 = vld [vmem:[%s1613_s30 + $0x278] sm:$0xff] }
  0x29   : > { %1469 = vmatpush.bf16.msra.mxu2 %v1633_v22 }
  0x2a   : > { %1461 = vmatpush.bf16.msra.mxu1 %v1638_v23 }
  0x2b   : > { %775 = vmatmul.bf16.vlgmr.msra.gmra.mxu0 %v290_v33  ;;  %785 = vmatmul.bf16.vlgmr.msra.gmra.mxu3 %v304_v34  ;;  %v264_v33 = vld [vmem:[%s1613_s30 + $0x2b0] sm:$0xff]  ;;  %v263_v34 = vld [vmem:[%s1613_s30 + $0x2a8] sm:$0xff] }
  0x2c   : > { %914 = vmatpush.bf16.msrb.mxu3 %v1428_v32  ;;  %816 = vmatpush.bf16.msrb.mxu0 %v1527_v2  ;;  %v243_v2 = vld [vmem:[%s1613_s30 + $0x208] sm:$0xff] }
  0x2d   : > { %883 = vmatmul.bf16.vlgmr.msra.gmra.mxu2 %v306_v35  ;;  %834 = vmatmul.bf16.vlgmr.msra.gmra.mxu1 %v305_v36  ;;  %v320_v9 = vpack.c.bf16 %v243_v2, %v236_v0  ;;  %v187_v32 = vld [vmem:[%s1613_s30 + $0x48] sm:$0xff]  ;;  %v270_v35 = vld [vmem:[%s1613_s30 + $0x2e0] sm:$0xff]  ;;  %v332_v36 = vpack.c.bf16 %v269_v30, %v262_v29 }
  0x2e   : > { %1068 = vmatpush.bf16.msrb.mxu2 %v1445_v37  ;;  %1012 = vmatpush.bf16.msrb.mxu1 %v1444_v38  ;;  %v292_v37 = vpack.c.bf16 %v187_v32, %v180_v31  ;;  %v190_v0 = vld [vmem:[%s1613_s30 + $0x60] sm:$0xff] }
  0x30   : > { %817 = vmatpush.bf16.msrb.mxu0 %v1542_v5  ;;  %915 = vmatpush.bf16.msrb.mxu3 %v1427_v39  ;;  %v242_v5 = vld [vmem:[%s1613_s30 + $0x200] sm:$0xff]  ;;  %v333_v39 = vpack.c.bf16 %v270_v35, %v263_v34 }
  0x32   : > { %1013 = vmatpush.bf16.msrb.mxu1 %v1443_v40  ;;  %v1433_v40 = vld [vmem:[%s1962_s1 + $0x120] sm:$0xff] }
  0x34   : > { %818 = vmatpush.bf16.msrb.mxu0 %v1557_v8  ;;  %916 = vmatpush.bf16.msrb.mxu3 %v1426_v41  ;;  %v291_v8 = vpack.c.bf16 %v186_v63, %v179_v62  ;;  %v1432_v41 = vld [vmem:[%s1962_s1 + $0x118] sm:$0xff]  ;;  %v191_v62 = vld [vmem:[%s1613_s30 + $0x68] sm:$0xff] }
  0x35   : > { %v183_v63 = vld [vmem:[%s1613_s30 + $0x28] sm:$0xff] }
  0x36   : > { %1014 = vmatpush.bf16.msrb.mxu1 %v1442_v42  ;;  %v276_v42 = vld [vmem:[%s1613_s30 + $0x310] sm:$0xff] }
  0x38   : > { %819 = vmatpush.bf16.msrb.mxu0 %v1572_v11  ;;  %917 = vmatpush.bf16.msrb.mxu3 %v1425_v43  ;;  %v319_v11 = vpack.c.bf16 %v242_v5, %v235_v3  ;;  %v283_v43 = vld [vmem:[%s1613_s30 + $0x348] sm:$0xff]  ;;  %v296_v5 = vpack.c.bf16 %v191_v62, %v184_v61 }
  0x39   : > { %v339_v51 = vpack.c.bf16 %v283_v43, %v276_v42  ;;  %v231_v42 = vld [vmem:[%s1613_s30 + $0x1a8] sm:$0xff]  ;;  %v226_v43 = vld [vmem:[%s1613_s30 + $0x180] sm:$0xff] }
  0x3a   : > { %1015 = vmatpush.bf16.msrb.mxu1 %v1441_v52  ;;  %v299_v52 = vpack.c.bf16 %v201_v45, %v194_v44  ;;  %v233_v44 = vld [vmem:[%s1613_s30 + $0x1b8] sm:$0xff] }
  0x3b   : > { %780 = vmatmul.bf16.gmra.mxu0 %v297_v53  ;;  %790 = vmatmul.bf16.gmra.mxu3 %v311_v54  ;;  %v341_v53 = vpack.c.bf16 %v285_v47, %v278_v46  ;;  %v340_v54 = vpack.c.bf16 %v284_v49, %v277_v48  ;;  %v225_v45 = vld [vmem:[%s1613_s30 + $0x178] sm:$0xff]  ;;  %v232_v46 = vld [vmem:[%s1613_s30 + $0x1b0] sm:$0xff] }
  0x3c   : > { %820 = vmatpush.bf16.msrb.mxu0 %v1589_v14  ;;  %918 = vmatpush.bf16.msrb.mxu3 %v1424_v57  ;;  %v1422_v14 = vld [vmem:[%s1962_s1 + $0xc8] sm:$0xff]  ;;  %v181_v57 = vld [vmem:[%s1613_s30 + $0x18] sm:$0xff] }
  0x3d   : > { %888 = vmatmul.bf16.gmra.mxu2 %v313_v55  ;;  %839 = vmatmul.bf16.gmra.mxu1 %v312_v56  ;;  %v1430_v55 = vld [vmem:[%s1962_s1 + $0x108] sm:$0xff]  ;;  %v1429_v56 = vld [vmem:[%s1962_s1 + $0x100] sm:$0xff] }
  0x3e   : > { %1016 = vmatpush.bf16.msrb.mxu1 %v1440_v58  ;;  %v188_v58 = vld [vmem:[%s1613_s30 + $0x50] sm:$0xff] }
  0x3f   : > { %v293_v2 = vpack.c.bf16 %v188_v58, %v181_v57 }
  0x40   : > { %821 = vmatpush.bf16.msrb.mxu0 %v1605_v17  ;;  %919 = vmatpush.bf16.msrb.mxu3 %v1423_v59  ;;  %v193_v17 = vld [vmem:[%s1613_s30 + $0x78] sm:$0xff]  ;;  %v182_v59 = vld [vmem:[%s1613_s30 + $0x20] sm:$0xff] }
  0x41   : > { %v298_v26 = vpack.c.bf16 %v200_v18, %v193_v17  ;;  %v294_v3 = vpack.c.bf16 %v189_v60, %v182_v59  ;;  %v204_v17 = vld [vmem:[%s1613_s30 + $0xd0] sm:$0xff] }
  0x42   : > { %1017 = vmatpush.bf16.msrb.mxu1 %v1439_v12  ;;  %v203_v12 = vld [vmem:[%s1613_s30 + $0xc8] sm:$0xff] }
  0x44   : > { %822 = vmatpush.bf16.msrb.mxu0 %v1625_v20  ;;  %920 = vmatpush.bf16.msrb.mxu3 %v1422_v14  ;;  %v250_v20 = vld [vmem:[%s1613_s30 + $0x240] sm:$0xff] }
  0x45   : > { %v327_v27 = vpack.c.bf16 %v257_v21, %v250_v20  ;;  %v198_v14 = vld [vmem:[%s1613_s30 + $0xa0] sm:$0xff] }
  0x48   : > { %823 = vmatpush.bf16.msrb.mxu0 %v1638_v23  ;;  %v249_v23 = vld [vmem:[%s1613_s30 + $0x238] sm:$0xff] }
  0x4b   : > { %795 = vmatmul.bf16.gmra.mxu3 %v318_v6  ;;  %824 = vmatmul.bf16.vlgmr.msrb.gmra.mxu0 %v291_v8  ;;  %v295_v6 = vpack.c.bf16 %v190_v0, %v183_v63  ;;  %v195_v8 = vld [vmem:[%s1613_s30 + $0x88] sm:$0xff] }
  0x4c   : > { %865 = vmatpush.bf16.msra.mxu0 %v1522_v1  ;;  %v248_v1 = vld [vmem:[%s1613_s30 + $0x230] sm:$0xff] }
  0x4d   : > { %893 = vmatmul.bf16.gmra.mxu2 %v320_v9  ;;  %844 = vmatmul.bf16.gmra.mxu1 %v319_v11  ;;  %v325_v25 = vpack.c.bf16 %v255_v15, %v248_v1  ;;  %v202_v9 = vld [vmem:[%s1613_s30 + $0xc0] sm:$0xff]  ;;  %v196_v11 = vld [vmem:[%s1613_s30 + $0x90] sm:$0xff]  ;;  %v205_v1 = vld [vmem:[%s1613_s30 + $0xd8] sm:$0xff] }
  0x4e   : > { %v197_v15 = vld [vmem:[%s1613_s30 + $0x98] sm:$0xff]  ;;  %v300_v18 = vpack.c.bf16 %v202_v9, %v195_v8  ;;  %v301_v20 = vpack.c.bf16 %v203_v12, %v196_v11  ;;  %v303_v21 = vpack.c.bf16 %v205_v1, %v198_v14  ;;  %v240_v8 = vld [vmem:[%s1613_s30 + $0x1f0] sm:$0xff]  ;;  %v247_v9 = vld [vmem:[%s1613_s30 + $0x228] sm:$0xff] }
  0x4f   : > { %v239_v11 = vld [vmem:[%s1613_s30 + $0x1e8] sm:$0xff]  ;;  %v246_v12 = vld [vmem:[%s1613_s30 + $0x220] sm:$0xff] }
  0x50   : > { %866 = vmatpush.bf16.msra.mxu0 %v1537_v4  ;;  %v326_v4 = vpack.c.bf16 %v256_v24, %v249_v23  ;;  %v302_v23 = vpack.c.bf16 %v204_v17, %v197_v15  ;;  %v209_v24 = vld [vmem:[%s1613_s30 + $0xf8] sm:$0xff] }
  0x54   : > { %867 = vmatpush.bf16.msra.mxu0 %v1552_v7  ;;  %v1438_v7 = vld [vmem:[%s1962_s1 + $0x148] sm:$0xff] }
  0x55   : > { %1018 = vmatpush.bf16.msrb.mxu1 %v1438_v7  ;;  %v219_v7 = vld [vmem:[%s1613_s30 + $0x148] sm:$0xff] }
  0x58   : > { %868 = vmatpush.bf16.msra.mxu0 %v1567_v10  ;;  %v1421_v10 = vld [vmem:[%s1962_s1 + $0xc0] sm:$0xff] }
  0x59   : > { %921 = vmatpush.bf16.msrb.mxu3 %v1421_v10  ;;  %1019 = vmatpush.bf16.msrb.mxu1 %v1437_v28  ;;  %v211_v10 = vld [vmem:[%s1613_s30 + $0x108] sm:$0xff] }
  0x5b   : > { %800 = vmatmul.bf16.gmra.mxu3 %v325_v25  ;;  %829 = vmatmul.bf16.gmra.mxu0 %v298_v26  ;;  %v216_v25 = vld [vmem:[%s1613_s30 + $0x130] sm:$0xff]  ;;  %v210_v26 = vld [vmem:[%s1613_s30 + $0x100] sm:$0xff] }
  0x5c   : > { %869 = vmatpush.bf16.msra.mxu0 %v1584_v13  ;;  %v1436_v13 = vld [vmem:[%s1962_s1 + $0x138] sm:$0xff]  ;;  %v307_v28 = vpack.c.bf16 %v216_v25, %v209_v24 }
  0x5d   : > { %898 = vmatmul.bf16.gmra.mxu2 %v327_v27  ;;  %849 = vmatmul.bf16.gmra.mxu1 %v326_v4  ;;  %v217_v27 = vld [vmem:[%s1613_s30 + $0x138] sm:$0xff]  ;;  %v212_v4 = vld [vmem:[%s1613_s30 + $0x110] sm:$0xff] }
  0x5e   : > { %v308_v29 = vpack.c.bf16 %v217_v27, %v210_v26  ;;  %v310_v31 = vpack.c.bf16 %v219_v7, %v212_v4 }
  0x60   : > { %870 = vmatpush.bf16.msra.mxu0 %v1600_v16  ;;  %v271_v16 = vld [vmem:[%s1613_s30 + $0x2e8] sm:$0xff] }
  0x61   : > { %v334_v38 = vpack.c.bf16 %v271_v16, %v264_v33  ;;  %v1814_v16 = vld [vmem:[%s1963_s2] ss:$0 sm:$0xff] }
  0x64   : > { %871 = vmatpush.bf16.msra.mxu0 %v1620_v19  ;;  %v1435_v19 = vld [vmem:[%s1962_s1 + $0x130] sm:$0xff] }
  0x68   : > { %872 = vmatpush.bf16.msra.mxu0 %v1633_v22  ;;  %v1434_v22 = vld [vmem:[%s1962_s1 + $0x128] sm:$0xff] }
  0x6b   : > { %805 = vmatmul.bf16.gmra.mxu3 %v332_v36  ;;  %873 = vmatmul.bf16.vlgmr.msra.gmra.mxu0 %v292_v37 }
  0x6c   : > { %963 = vmatpush.bf16.msrb.mxu0 %v1436_v13  ;;  %v218_v13 = vld [vmem:[%s1613_s30 + $0x140] sm:$0xff] }
  0x6d   : > { %903 = vmatmul.bf16.gmra.mxu2 %v334_v38  ;;  %854 = vmatmul.bf16.gmra.mxu1 %v333_v39  ;;  %v309_v32 = vpack.c.bf16 %v218_v13, %v211_v10 }
  0x70   : > { %964 = vmatpush.bf16.msrb.mxu0 %v1435_v19 }
  0x74   : > { %965 = vmatpush.bf16.msrb.mxu0 %v1434_v22  ;;  %v223_v22 = vld [vmem:[%s1613_s30 + $0x168] sm:$0xff] }
  0x78   : > { %966 = vmatpush.bf16.msrb.mxu0 %v1433_v40  ;;  %v230_v40 = vld [vmem:[%s1613_s30 + $0x1a0] sm:$0xff] }
  0x7b   : > { %810 = vmatmul.bf16.gmra.mxu3 %v339_v51  ;;  %878 = vmatmul.bf16.gmra.mxu0 %v299_v52 }
  0x7c   : > { %967 = vmatpush.bf16.msrb.mxu0 %v1432_v41  ;;  %v224_v41 = vld [vmem:[%s1613_s30 + $0x170] sm:$0xff] }
  0x7d   : > { %908 = vmatmul.bf16.gmra.mxu2 %v341_v53  ;;  %859 = vmatmul.bf16.gmra.mxu1 %v340_v54  ;;  %v315_v51 = vpack.c.bf16 %v231_v42, %v224_v41  ;;  %v317_v53 = vpack.c.bf16 %v233_v44, %v226_v43  ;;  %v316_v54 = vpack.c.bf16 %v232_v46, %v225_v45 }
  0x80   : > { %968 = vmatpush.bf16.msrb.mxu0 %v1431_v50  ;;  %v314_v50 = vpack.c.bf16 %v230_v40, %v223_v22 }
  0x84   : > { %969 = vmatpush.bf16.msrb.mxu0 %v1430_v55 }
  0x88   : > { %970 = vmatpush.bf16.msrb.mxu0 %v1429_v56 }
  0x8b   : > { %922 = vmatmul.bf16.vlgmr.msrb.gmra.mxu3 %v293_v2  ;;  %971 = vmatmul.bf16.vlgmr.msrb.gmra.mxu0 %v294_v3  ;;  %v237_v2 = vld [vmem:[%s1613_s30 + $0x1d8] sm:$0xff]  ;;  %v244_v3 = vld [vmem:[%s1613_s30 + $0x210] sm:$0xff] }
  0x8c   : > { %v321_v17 = vpack.c.bf16 %v244_v3, %v237_v2  ;;  %v268_v2 = vld [vmem:[%s1613_s30 + $0x2d0] sm:$0xff]  ;;  %v275_v3 = vld [vmem:[%s1613_s30 + $0x308] sm:$0xff] }
  0x8d   : > { %1387 = vmatmul.msk.bf16.vlgmr.msrb.gmra.mxu2 %vm742_vm0, %v296_v5  ;;  %1020 = vmatmul.bf16.vlgmr.msrb.gmra.mxu1 %v295_v6  ;;  %v238_v5 = vld [vmem:[%s1613_s30 + $0x1e0] sm:$0xff]  ;;  %v245_v6 = vld [vmem:[%s1613_s30 + $0x218] sm:$0xff] }
  0x9b   : > { %927 = vmatmul.bf16.gmra.mxu3 %v300_v18  ;;  %976 = vmatmul.bf16.gmra.mxu0 %v301_v20  ;;  %v322_v18 = vpack.c.bf16 %v245_v6, %v238_v5  ;;  %v267_v5 = vld [vmem:[%s1613_s30 + $0x2c8] sm:$0xff]  ;;  %v274_v6 = vld [vmem:[%s1613_s30 + $0x300] sm:$0xff] }
  0x9d   : > { %1388 = vmatmul.msk.bf16.gmra.mxu2 %vm742_vm0, %v303_v21  ;;  %1025 = vmatmul.bf16.gmra.mxu1 %v302_v23  ;;  %v324_v21 = vpack.c.bf16 %v247_v9, %v240_v8  ;;  %v323_v23 = vpack.c.bf16 %v246_v12, %v239_v11 }
  0xa8   : > { %v1809_v30 = vpop.f32.mrf.mxu0 }
  0xaa   : > { %v835_v33 = vpop.f32.mrf.mxu1 }
  0xab   : > { %932 = vmatmul.bf16.gmra.mxu3 %v307_v28  ;;  %981 = vmatmul.bf16.gmra.mxu0 %v308_v29 }
  0xad   : > { %1389 = vmatmul.msk.bf16.gmra.mxu2 %vm742_vm0, %v310_v31  ;;  %1030 = vmatmul.bf16.gmra.mxu1 %v309_v32  ;;  %v251_v31 = vld [vmem:[%s1613_s30 + $0x248] sm:$0xff]  ;;  %v258_v32 = vld [vmem:[%s1613_s30 + $0x280] sm:$0xff] }
  0xae   : > { %v786_v34 = vpop.f32.mrf.mxu3  ;;  %v328_v42 = vpack.c.bf16 %v258_v32, %v251_v31  ;;  %v279_v31 = vld [vmem:[%s1613_s30 + $0x328] sm:$0xff]  ;;  %v286_v32 = vld [vmem:[%s1613_s30 + $0x360] sm:$0xff] }
  0xaf   : > { %v787_v35 = vadd.f32 %v1814_v16, %v786_v34  ;;  %v259_v34 = vld [vmem:[%s1613_s30 + $0x288] sm:$0xff] }
  0xb0   : > { %v884_v19 = vpop.f32.mrf.mxu2  ;;  %v1818_v36 = vpop.f32.mrf.mxu0 }
  0xb1   : > { %v836_v37 = vadd.f32 %v835_v33, %v787_v35  ;;  %v252_v33 = vld [vmem:[%s1613_s30 + $0x250] sm:$0xff]  ;;  %v254_v35 = vld [vmem:[%s1613_s30 + $0x260] sm:$0xff] }
  0xb2   : > { %v837_v38 = vpop.f32.mrf.mxu1  ;;  %v329_v43 = vpack.c.bf16 %v259_v34, %v252_v33  ;;  %v280_v33 = vld [vmem:[%s1613_s30 + $0x330] sm:$0xff]  ;;  %v287_v34 = vld [vmem:[%s1613_s30 + $0x368] sm:$0xff] }
  0xb3   : > { %v1820_v39 = vadd.f32 %v884_v19, %v836_v37  ;;  %v261_v19 = vld [vmem:[%s1613_s30 + $0x298] sm:$0xff] }
  0xb4   : > { %v253_v37 = vld [vmem:[%s1613_s30 + $0x258] sm:$0xff]  ;;  %v331_v45 = vpack.c.bf16 %v261_v19, %v254_v35  ;;  %v282_v35 = vld [vmem:[%s1613_s30 + $0x340] sm:$0xff] }
  0xb5   : > { %v289_v19 = vld [vmem:[%s1613_s30 + $0x378] sm:$0xff] }
  0xb6   : > { %v788_v47 = vpop.f32.mrf.mxu3 }
  0xb7   : > { %v789_v48 = vadd.f32 %v1814_v16, %v788_v47 }
  0xb8   : > { %v886_v49 = vpop.f32.mrf.mxu2  ;;  %v1831_v52 = vpop.f32.mrf.mxu0 }
  0xb9   : > { %v838_v55 = vadd.f32 %v837_v38, %v789_v48  ;;  %v260_v38 = vld [vmem:[%s1613_s30 + $0x290] sm:$0xff] }
  0xba   : > { %v840_v56 = vpop.f32.mrf.mxu1  ;;  %v330_v46 = vpack.c.bf16 %v260_v38, %v253_v37  ;;  %v281_v37 = vld [vmem:[%s1613_s30 + $0x338] sm:$0xff]  ;;  %v288_v38 = vld [vmem:[%s1613_s30 + $0x370] sm:$0xff] }
  0xbb   : > { %v1833_v57 = vadd.f32 %v886_v49, %v838_v55  ;;  %937 = vmatmul.bf16.gmra.mxu3 %v314_v50  ;;  %986 = vmatmul.bf16.gmra.mxu0 %v315_v51 }
  0xbd   : > { %1390 = vmatmul.msk.bf16.gmra.mxu2 %vm742_vm0, %v317_v53  ;;  %1035 = vmatmul.bf16.gmra.mxu1 %v316_v54 }
  0xbe   : > { %v791_v58 = vpop.f32.mrf.mxu3 }
  0xbf   : > { %v792_v59 = vadd.f32 %v1814_v16, %v791_v58 }
  0xc0   : > { %v889_v60 = vpop.f32.mrf.mxu2  ;;  %v1837_v61 = vpop.f32.mrf.mxu0 }
  0xc1   : > { %v841_v62 = vadd.f32 %v840_v56, %v792_v59  ;;  %v265_v59 = vld [vmem:[%s1613_s30 + $0x2b8] sm:$0xff] }
  0xc2   : > { %v842_v63 = vpop.f32.mrf.mxu1 }
  0xc3   : > { %v1839_v0 = vadd.f32 %v889_v60, %v841_v62  ;;  %v272_v60 = vld [vmem:[%s1613_s30 + $0x2f0] sm:$0xff]  ;;  %v266_v62 = vld [vmem:[%s1613_s30 + $0x2c0] sm:$0xff] }
  0xc4   : > { %v335_v12 = vpack.c.bf16 %v272_v60, %v265_v59 }
  0xc6   : > { %v793_v14 = vpop.f32.mrf.mxu3 }
  0xc7   : > { %v794_v1 = vadd.f32 %v1814_v16, %v793_v14 }
  0xc8   : > { %v891_v15 = vpop.f32.mrf.mxu2  ;;  %v1850_v20 = vpop.f32.mrf.mxu0 }
  0xc9   : > { %v843_v24 = vadd.f32 %v842_v63, %v794_v1  ;;  %v273_v63 = vld [vmem:[%s1613_s30 + $0x2f8] sm:$0xff]  ;;  %s1190_s30 = sshll.u32 %s1966_s5, 3 }
  0xca   : > { %v845_v25 = vpop.f32.mrf.mxu1  ;;  %v336_v14 = vpack.c.bf16 %v273_v63, %v266_v62  ;;  %s1922_s22 = scalar_lea.vmem %s1964_s3, %s1190_s30 }
  0xcb   : > { %v1852_v26 = vadd.f32 %v891_v15, %v843_v24  ;;  %942 = vmatmul.bf16.gmra.mxu3 %v321_v17  ;;  %991 = vmatmul.bf16.gmra.mxu0 %v322_v18  ;;  %v338_v15 = vpack.c.bf16 %v275_v3, %v268_v2  ;;  %v337_v17 = vpack.c.bf16 %v274_v6, %v267_v5 }
  0xcd   : > { %1391 = vmatmul.msk.bf16.gmra.mxu2 %vm742_vm0, %v324_v21  ;;  %1040 = vmatmul.bf16.gmra.mxu1 %v323_v23 }
  0xce   : > { %v796_v27 = vpop.f32.mrf.mxu3 }
  0xcf   : > { %v797_v4 = vadd.f32 %v1814_v16, %v796_v27 }
  0xd0   : > { %v894_v7 = vpop.f32.mrf.mxu2  ;;  %v1856_v10 = vpop.f32.mrf.mxu0 }
  0xd1   : > { %v846_v13 = vadd.f32 %v845_v25, %v797_v4 }
  0xd2   : > { %v847_v28 = vpop.f32.mrf.mxu1 }
  0xd3   : > { %v1858_v29 = vadd.f32 %v894_v7, %v846_v13 }
  0xd6   : > { %v798_v22 = vpop.f32.mrf.mxu3 }
  0xd7   : > { %v799_v40 = vadd.f32 %v1814_v16, %v798_v22 }
  0xd8   : > { %v896_v41 = vpop.f32.mrf.mxu2  ;;  %v1869_v44 = vpop.f32.mrf.mxu0 }
  0xd9   : > { %v848_v47 = vadd.f32 %v847_v28, %v799_v40 }
  0xda   : > { %v850_v48 = vpop.f32.mrf.mxu1 }
  0xdb   : > { %v1871_v49 = vadd.f32 %v896_v41, %v848_v47  ;;  %947 = vmatmul.bf16.gmra.mxu3 %v328_v42  ;;  %996 = vmatmul.bf16.gmra.mxu0 %v329_v43  ;;  %v342_v42 = vpack.c.bf16 %v286_v32, %v279_v31  ;;  %v343_v43 = vpack.c.bf16 %v287_v34, %v280_v33 }
  0xdc   : > { %v344_v47 = vpack.c.bf16 %v288_v38, %v281_v37  ;;  %v782_v34 = vadd.f32 %v1814_v16, %v1831_v52 }
  0xdd   : > { %1392 = vmatmul.msk.bf16.gmra.mxu2 %vm742_vm0, %v331_v45  ;;  %1045 = vmatmul.bf16.gmra.mxu1 %v330_v46  ;;  %v345_v46 = vpack.c.bf16 %v289_v19, %v282_v35 }
  0xde   : > { %v801_v50 = vpop.f32.mrf.mxu3  ;;  %v831_v19 = vadd.f32 %v1869_v44, %v782_v34 }
  0xdf   : > { %v802_v51 = vadd.f32 %v1814_v16, %v801_v50 }
  0xe0   : > { %v899_v53 = vpop.f32.mrf.mxu2  ;;  %v1875_v54 = vpop.f32.mrf.mxu0 }
  0xe1   : > { %v851_v55 = vadd.f32 %v850_v48, %v802_v51 }
  0xe2   : > { %v852_v56 = vpop.f32.mrf.mxu1 }
  0xe3   : > { %v1877_v58 = vadd.f32 %v899_v53, %v851_v55 }
  0xe6   : > { %v803_v8 = vpop.f32.mrf.mxu3 }
  0xe7   : > { %v804_v9 = vadd.f32 %v1814_v16, %v803_v8  ;;  %v777_v8 = vadd.f32 %v1814_v16, %v1809_v30 }
  0xe8   : > { %v901_v11 = vpop.f32.mrf.mxu2  ;;  %v874_v1 = vpop.f32.mrf.mxu0 }
  0xe9   : > { %v853_v18 = vadd.f32 %v852_v56, %v804_v9 }
  0xea   : > { %v855_v21 = vpop.f32.mrf.mxu1 }
  0xeb   : > { %v1888_v23 = vadd.f32 %v901_v11, %v853_v18  ;;  %952 = vmatmul.bf16.gmra.mxu3 %v335_v12  ;;  %1001 = vmatmul.bf16.gmra.mxu0 %v336_v14  ;;  %v826_v12 = vadd.f32 %v1850_v20, %v777_v8 }
  0xed   : > { %1393 = vmatmul.msk.bf16.gmra.mxu2 %vm742_vm0, %v338_v15  ;;  %1050 = vmatmul.bf16.gmra.mxu1 %v337_v17  ;;  %v875_v15 = vadd.f32 %v874_v1, %v826_v12 }
  0xee   : > { %v806_v24 = vpop.f32.mrf.mxu3 }
  0xef   : > { %v807_v25 = vadd.f32 %v1814_v16, %v806_v24 }
  0xf0   : > { %v904_v27 = vpop.f32.mrf.mxu2  ;;  %v876_v4 = vpop.f32.mrf.mxu0 }
  0xf1   : > { %v856_v7 = vadd.f32 %v855_v21, %v807_v25  ;;  %v779_v25 = vadd.f32 %v1814_v16, %v1818_v36 }
  0xf2   : > { %v857_v13 = vpop.f32.mrf.mxu1 }
  0xf3   : > { %v1892_v28 = vadd.f32 %v904_v27, %v856_v7 }
  0xf6   : > { %v808_v22 = vpop.f32.mrf.mxu3 }
  0xf7   : > { %v809_v40 = vadd.f32 %v1814_v16, %v808_v22 }
  0xf8   : > { %v906_v41 = vpop.f32.mrf.mxu2  ;;  %v879_v45 = vpop.f32.mrf.mxu0 }
  0xf9   : > { %v858_v48 = vadd.f32 %v857_v13, %v809_v40  ;;  %v828_v13 = vadd.f32 %v1856_v10, %v779_v25  ;;  %v880_v38 = vadd.f32 %v879_v45, %v831_v19 }
  0xfa   : > { %v860_v50 = vpop.f32.mrf.mxu1 }
  0xfb   : > { %v1903_v51 = vadd.f32 %v906_v41, %v858_v48  ;;  %957 = vmatmul.bf16.gmra.mxu3 %v342_v42  ;;  %1006 = vmatmul.bf16.gmra.mxu0 %v343_v43  ;;  %v877_v20 = vadd.f32 %v876_v4, %v828_v13  ;;  %v784_v43 = vadd.f32 %v1814_v16, %v1837_v61 }
  0xfd   : > { %1394 = vmatmul.msk.bf16.gmra.mxu2 %vm742_vm0, %v345_v46  ;;  %1055 = vmatmul.bf16.gmra.mxu1 %v344_v47  ;;  %v833_v52 = vadd.f32 %v1875_v54, %v784_v43 }
  0xfe   : > { %v811_v53 = vpop.f32.mrf.mxu3 }
  0xff   : > { %v812_v55 = vadd.f32 %v1814_v16, %v811_v53 }
 0x100   : > { %v909_v56 = vpop.f32.mrf.mxu2  ;;  %v881_v59 = vpop.f32.mrf.mxu0 }
 0x101   : > { %v861_v60 = vadd.f32 %v860_v50, %v812_v55  ;;  %v882_v50 = vadd.f32 %v881_v59, %v833_v52 }
 0x102   : > { %v862_v62 = vpop.f32.mrf.mxu1 }
 0x103   : > { %v1907_v63 = vadd.f32 %v909_v56, %v861_v60 }
 0x106   : > { %v813_v2 = vpop.f32.mrf.mxu3 }
 0x107   : > { %v814_v3 = vadd.f32 %v1814_v16, %v813_v2 }
 0x108   : > { %v911_v5 = vpop.f32.mrf.mxu2  ;;  %v972_v6 = vpop.f32.mrf.mxu0 }
 0x109   : > { %v863_v9 = vadd.f32 %v862_v62, %v814_v3 }
 0x10a   : > { %v1021_v11 = vpop.f32.mrf.mxu1 }
 0x10b   : > { %v1913_v14 = vadd.f32 %v911_v5, %v863_v9 }
 0x10e   : > { %v923_v17 = vpop.f32.mrf.mxu3 }
 0x10f   : > { %v924_v18 = vadd.f32 %v923_v17, %v875_v15 }
 0x110   : > { %v1070_v21 = vpop.f32.mrf.mxu2  ;;  %v974_v24 = vpop.f32.mrf.mxu0 }
 0x111   : > { %v973_v27 = vadd.f32 %v972_v6, %v924_v18 }
 0x112   : > { %v1023_v7 = vpop.f32.mrf.mxu1 }
 0x113   : > { %v1022_v30 = vadd.f32 %v1021_v11, %v973_v27 }
 0x115   : > { %v1071_v1 = vadd.f32 %v1070_v21, %v1022_v30 }
 0x116   : > { %v925_v31 = vpop.f32.mrf.mxu3 }
 0x117   : > { %1110 = vst [vmem:[%s1922_s22] sm:$0xff] %v1071_v1  ;;  %v926_v32 = vadd.f32 %v925_v31, %v877_v20 }
 0x118   : > { %v1072_v33 = vpop.f32.mrf.mxu2  ;;  %v977_v36 = vpop.f32.mrf.mxu0 }
 0x119   : > { %v975_v35 = vadd.f32 %v974_v24, %v926_v32 }
 0x11a   : > { %v1026_v10 = vpop.f32.mrf.mxu1 }
 0x11b   : > { %v1024_v37 = vadd.f32 %v1023_v7, %v975_v35 }
 0x11d   : > { %v1073_v22 = vadd.f32 %v1072_v33, %v1024_v37 }
 0x11e   : > { %v928_v40 = vpop.f32.mrf.mxu3 }
 0x11f   : > { %1111 = vst [vmem:[%s1922_s22 + $0x8] sm:$0xff] %v1073_v22  ;;  %v929_v4 = vadd.f32 %v928_v40, %v880_v38 }
 0x120   : > { %v1075_v41 = vpop.f32.mrf.mxu2  ;;  %v979_v42 = vpop.f32.mrf.mxu0 }
 0x121   : > { %v978_v46 = vadd.f32 %v977_v36, %v929_v4 }
 0x122   : > { %v1028_v47 = vpop.f32.mrf.mxu1 }
 0x123   : > { %v1027_v48 = vadd.f32 %v1026_v10, %v978_v46 }
 0x125   : > { %v1076_v44 = vadd.f32 %v1075_v41, %v1027_v48 }
 0x126   : > { %v930_v53 = vpop.f32.mrf.mxu3 }
 0x127   : > { %1112 = vst [vmem:[%s1922_s22 + $0x10] sm:$0xff] %v1076_v44  ;;  %v931_v45 = vadd.f32 %v930_v53, %v882_v50 }
 0x128   : > { %v1077_v55 = vpop.f32.mrf.mxu2  ;;  %v982_v56 = vpop.f32.mrf.mxu0 }
 0x129   : > { %v980_v60 = vadd.f32 %v979_v42, %v931_v45 }
 0x12a   : > { %v1031_v62 = vpop.f32.mrf.mxu1 }
 0x12b   : > { %v1029_v2 = vadd.f32 %v1028_v47, %v980_v60 }
 0x12d   : > { %v1078_v3 = vadd.f32 %v1077_v55, %v1029_v2 }
 0x12e   : > { %v933_v5 = vpop.f32.mrf.mxu3 }
 0x12f   : > { %1113 = vst [vmem:[%s1922_s22 + $0x18] sm:$0xff] %v1078_v3  ;;  %v934_v16 = vadd.f32 %v933_v5, %v1820_v39 }
 0x130   : > { %v1080_v61 = vpop.f32.mrf.mxu2  ;;  %v984_v54 = vpop.f32.mrf.mxu0 }
 0x131   : > { %v983_v6 = vadd.f32 %v982_v56, %v934_v16 }
 0x132   : > { %v1033_v59 = vpop.f32.mrf.mxu1 }
 0x133   : > { %v1032_v8 = vadd.f32 %v1031_v62, %v983_v6 }
 0x135   : > { %v1081_v9 = vadd.f32 %v1080_v61, %v1032_v8 }
 0x136   : > { %v935_v11 = vpop.f32.mrf.mxu3 }
 0x137   : > { %1114 = vst [vmem:[%s1922_s22 + $0x20] sm:$0xff] %v1081_v9  ;;  %v936_v12 = vadd.f32 %v935_v11, %v1833_v57 }
 0x138   : > { %v1082_v15 = vpop.f32.mrf.mxu2  ;;  %v987_v17 = vpop.f32.mrf.mxu0 }
 0x139   : > { %v985_v18 = vadd.f32 %v984_v54, %v936_v12 }
 0x13a   : > { %v1036_v21 = vpop.f32.mrf.mxu1 }
 0x13b   : > { %v1034_v24 = vadd.f32 %v1033_v59, %v985_v18 }
 0x13d   : > { %v1083_v25 = vadd.f32 %v1082_v15, %v1034_v24 }
 0x13e   : > { %v938_v27 = vpop.f32.mrf.mxu3 }
 0x13f   : > { %1115 = vst [vmem:[%s1922_s22 + $0x28] sm:$0xff] %v1083_v25  ;;  %v939_v39 = vadd.f32 %v938_v27, %v1839_v0 }
 0x140   : > { %v1085_v7 = vpop.f32.mrf.mxu2  ;;  %v989_v13 = vpop.f32.mrf.mxu0 }
 0x141   : > { %v988_v30 = vadd.f32 %v987_v17, %v939_v39 }
 0x142   : > { %v1038_v20 = vpop.f32.mrf.mxu1 }
 0x143   : > { %v1037_v1 = vadd.f32 %v1036_v21, %v988_v30 }
 0x145   : > { %v1086_v31 = vadd.f32 %v1085_v7, %v1037_v1 }
 0x146   : > { %v940_v32 = vpop.f32.mrf.mxu3 }
 0x147   : > { %1116 = vst [vmem:[%s1922_s22 + $0x30] sm:$0xff] %v1086_v31  ;;  %v941_v57 = vadd.f32 %v940_v32, %v1852_v26 }
 0x148   : > { %v1087_v33 = vpop.f32.mrf.mxu2  ;;  %v992_v36 = vpop.f32.mrf.mxu0 }
 0x149   : > { %v990_v34 = vadd.f32 %v989_v13, %v941_v57 }
 0x14a   : > { %v1041_v35 = vpop.f32.mrf.mxu1 }
 0x14b   : > { %v1039_v10 = vadd.f32 %v1038_v20, %v990_v34 }
 0x14d   : > { %v1088_v19 = vadd.f32 %v1087_v33, %v1039_v10 }
 0x14e   : > { %v943_v37 = vpop.f32.mrf.mxu3 }
 0x14f   : > { %1117 = vst [vmem:[%s1922_s22 + $0x38] sm:$0xff] %v1088_v19  ;;  %v944_v0 = vadd.f32 %v943_v37, %v1858_v29 }
 0x150   : > { %v1090_v38 = vpop.f32.mrf.mxu2  ;;  %v994_v22 = vpop.f32.mrf.mxu0 }
 0x151   : > { %v993_v40 = vadd.f32 %v992_v36, %v944_v0 }
 0x152   : > { %v1043_v4 = vpop.f32.mrf.mxu1 }
 0x153   : > { %v1042_v41 = vadd.f32 %v1041_v35, %v993_v40 }
 0x155   : > { %v1091_v42 = vadd.f32 %v1090_v38, %v1042_v41 }
 0x156   : > { %v945_v43 = vpop.f32.mrf.mxu3 }
 0x157   : > { %1118 = vst [vmem:[%s1922_s22 + $0x40] sm:$0xff] %v1091_v42  ;;  %v946_v26 = vadd.f32 %v945_v43, %v1871_v49 }
 0x158   : > { %v1092_v46 = vpop.f32.mrf.mxu2  ;;  %v997_v47 = vpop.f32.mrf.mxu0 }
 0x159   : > { %v995_v52 = vadd.f32 %v994_v22, %v946_v26 }
 0x15a   : > { %v1046_v48 = vpop.f32.mrf.mxu1 }
 0x15b   : > { %v1044_v50 = vadd.f32 %v1043_v4, %v995_v52 }
 0x15d   : > { %v1093_v44 = vadd.f32 %v1092_v46, %v1044_v50 }
 0x15e   : > { %v948_v53 = vpop.f32.mrf.mxu3 }
 0x15f   : > { %1119 = vst [vmem:[%s1922_s22 + $0x48] sm:$0xff] %v1093_v44  ;;  %v949_v29 = vadd.f32 %v948_v53, %v1877_v58 }
 0x160   : > { %v1095_v45 = vpop.f32.mrf.mxu2  ;;  %v999_v55 = vpop.f32.mrf.mxu0 }
 0x161   : > { %v998_v56 = vadd.f32 %v997_v47, %v949_v29 }
 0x162   : > { %v1048_v60 = vpop.f32.mrf.mxu1 }
 0x163   : > { %v1047_v62 = vadd.f32 %v1046_v48, %v998_v56 }
 0x165   : > { %v1096_v2 = vadd.f32 %v1095_v45, %v1047_v62 }
 0x166   : > { %v950_v3 = vpop.f32.mrf.mxu3 }
 0x167   : > { %1120 = vst [vmem:[%s1922_s22 + $0x50] sm:$0xff] %v1096_v2  ;;  %v951_v49 = vadd.f32 %v950_v3, %v1888_v23 }
 0x168   : > { %v1097_v5 = vpop.f32.mrf.mxu2  ;;  %v1002_v61 = vpop.f32.mrf.mxu0 }
 0x169   : > { %v1000_v16 = vadd.f32 %v999_v55, %v951_v49 }
 0x16a   : > { %v1051_v6 = vpop.f32.mrf.mxu1 }
 0x16b   : > { %v1049_v54 = vadd.f32 %v1048_v60, %v1000_v16 }
 0x16d   : > { %v1098_v59 = vadd.f32 %v1097_v5, %v1049_v54 }
 0x16e   : > { %v953_v8 = vpop.f32.mrf.mxu3 }
 0x16f   : > { %1121 = vst [vmem:[%s1922_s22 + $0x58] sm:$0xff] %v1098_v59  ;;  %v954_v58 = vadd.f32 %v953_v8, %v1892_v28 }
 0x170   : > { %v1100_v9 = vpop.f32.mrf.mxu2  ;;  %v1004_v15 = vpop.f32.mrf.mxu0 }
 0x171   : > { %v1003_v11 = vadd.f32 %v1002_v61, %v954_v58 }
 0x172   : > { %v1053_v18 = vpop.f32.mrf.mxu1 }
 0x173   : > { %v1052_v12 = vadd.f32 %v1051_v6, %v1003_v11 }
 0x175   : > { %v1101_v17 = vadd.f32 %v1100_v9, %v1052_v12 }
 0x176   : > { %v955_v21 = vpop.f32.mrf.mxu3 }
 0x177   : > { %1122 = vst [vmem:[%s1922_s22 + $0x60] sm:$0xff] %v1101_v17  ;;  %v956_v23 = vadd.f32 %v955_v21, %v1903_v51 }
 0x178   : > { %v1102_v24 = vpop.f32.mrf.mxu2  ;;  %v1007_v7 = vpop.f32.mrf.mxu0 }
 0x179   : > { %v1005_v25 = vadd.f32 %v1004_v15, %v956_v23 }
 0x17a   : > { %v1056_v30 = vpop.f32.mrf.mxu1 }
 0x17b   : > { %v1054_v27 = vadd.f32 %v1053_v18, %v1005_v25 }
 0x17d   : > { %v1103_v39 = vadd.f32 %v1102_v24, %v1054_v27 }
 0x17e   : > { %v958_v13 = vpop.f32.mrf.mxu3 }
 0x17f   : > { %1123 = vst [vmem:[%s1922_s22 + $0x68] sm:$0xff] %v1103_v39  ;;  %v959_v28 = vadd.f32 %v958_v13, %v1907_v63 }
 0x180   : > { %v1105_v1 = vpop.f32.mrf.mxu2  ;;  %v1009_v51 = vpop.f32.mrf.mxu0 }
 0x181   : > { %v1008_v20 = vadd.f32 %v1007_v7, %v959_v28 }
 0x182   : > { %v1058_v34 = vpop.f32.mrf.mxu1 }
 0x183   : > { %v1057_v31 = vadd.f32 %v1056_v30, %v1008_v20 }
 0x185   : > { %v1106_v32 = vadd.f32 %v1105_v1, %v1057_v31 }
 0x186   : > { %v960_v57 = vpop.f32.mrf.mxu3 }
 0x187   : > { %1124 = vst [vmem:[%s1922_s22 + $0x70] sm:$0xff] %v1106_v32  ;;  %v961_v33 = vadd.f32 %v960_v57, %v1913_v14 }
 0x188   : > { %v1107_v10 = vpop.f32.mrf.mxu2 }
 0x189   : > { %v1010_v36 = vadd.f32 %v1009_v51, %v961_v33 }
 0x18b   : > { %v1059_v35 = vadd.f32 %v1058_v34, %v1010_v36 }
 0x18d   : > { %v1108_v19 = vadd.f32 %v1107_v10, %v1059_v35 }
 0x18f   : > { %1125 = vst [vmem:[%s1922_s22 + $0x78] sm:$0xff] %v1108_v19 }
 0x190 PF: > { %s13_s12 = sadd.s32 1, %s1486_s12  }
 0x191   : > { %p10_p4 = scmp.ge.s32.totalorder %s13_s12, 4  }
 0x193   :  { %12 = sbr.rel (!%p10_p4) target bundleno = 1 (0x1), region = 62 }

</bundles_post_ra>
